<compile_context>
chip_gen: v5e
topology: v5e:2x2
jax: 0.10.0
libtpu: 0.0.40
codegen_flags: <defaults>
</compile_context>

<pallas_src>
import math

import jax
import jax.numpy as jnp
from jax import lax
from jax.experimental import pallas as pl
from jax.experimental.pallas import tpu as pltpu

# ---- problem sizes (small, consistent with the module) ----
B = 2            # batch
T = 8            # num_tokens == context_length
D_IN = 32        # input feature dim
D_OUT = 32       # output feature dim
NUM_HEADS = 4
HEAD_DIM = D_OUT // NUM_HEADS
DROPOUT_P = 0.0  # nn.Dropout(0.0) == identity
NEG_BIG = -1e30  # large finite negative: same softmax result as -inf, more robust


def _mha_kernel(x_ref, wqkv_ref, wo_ref, bo_ref, o_ref):
    """Single grid step: whole batch processed as one slab held in VMEM.

    x_ref    : (B*T, D_IN)                 flattened input
    wqkv_ref : (3*H, D_IN, HEAD_DIM)       per-head [Wq*scale | Wk | Wv], x @ W layout
    wo_ref   : (H, HEAD_DIM, D_OUT)        per-head row blocks of out_proj (x @ W layout)
    bo_ref   : (1, D_OUT)                  out_proj bias
    o_ref    : (B*T, D_OUT)
    """
    x = x_ref[...]                                                    # (B*T, D_IN)

    # Causal mask: built once, reused across the statically-unrolled head loop
    # (broadcast_in_dim is not CSE'd, so hoisting avoids re-emission per head).
    row = lax.broadcasted_iota(jnp.int32, (T, T), 0)
    col = lax.broadcasted_iota(jnp.int32, (T, T), 1)
    causal = (col > row)[None]                                        # (1, T, T)

    acc = None
    for h in range(NUM_HEADS):
        # Per-head projections via static first-axis weight views (no lane slicing).
        # Softmax 1/sqrt(head_dim) scale is folded into the query weights on the host.
        q = jnp.dot(x, wqkv_ref[h], preferred_element_type=jnp.float32)                  # (B*T, HD)
        k = jnp.dot(x, wqkv_ref[NUM_HEADS + h], preferred_element_type=jnp.float32)      # (B*T, HD)
        v = jnp.dot(x, wqkv_ref[2 * NUM_HEADS + h], preferred_element_type=jnp.float32)  # (B*T, HD)

        q = q.reshape(B, T, HEAD_DIM)       # leading/sublane-only splits (no lane relayout)
        k = k.reshape(B, T, HEAD_DIM)
        v = v.reshape(B, T, HEAD_DIM)

        # Scores for this head, batched over B.
        # TODO(synk): if a Mosaic dump shows an explicit vxpose for the K operand,
        # produce K pre-transposed at the projection; otherwise this is free.
        s = jnp.einsum("bqd,bkd->bqk", q, k, preferred_element_type=jnp.float32)  # (B, T, T)
        s = jnp.where(causal, NEG_BIG, s)

        # Softmax along keys (f32); reciprocal goes to the EUP slot.
        m = jnp.max(s, axis=-1, keepdims=True)
        e = jnp.exp(s - m)
        w = e * pl.reciprocal(jnp.sum(e, axis=-1, keepdims=True), approx=True)
        # dropout(p=0.0) is the identity.

        ctx = jnp.einsum("bqk,bkd->bqd", w, v, preferred_element_type=jnp.float32)  # (B, T, HD)
        ctx = ctx.reshape(B * T, HEAD_DIM)                                           # (B*T, HD)

        # Fold the head merge into the output projection:
        #   concat_h(ctx_h) @ Wo^T  ==  sum_h ctx_h @ Wo^T[h*HD:(h+1)*HD, :]
        contrib = jnp.dot(ctx, wo_ref[h], preferred_element_type=jnp.float32)        # (B*T, D_OUT)
        acc = contrib if acc is None else acc + contrib

    o_ref[...] = (acc + bo_ref[...]).astype(o_ref.dtype)


def prepare_mha_params(wq, wk, wv, wo, bo):
    """One-time host-side weight prep (hoisted out of the per-call path).

    nn.Linear convention: W is (out_features, in_features), y = x @ W.T + b.
    Returns:
      wqkv_h : (3*NUM_HEADS, D_IN, HEAD_DIM)  [Wq*scale per head | Wk per head | Wv per head]
      wo_h   : (NUM_HEADS, HEAD_DIM, D_OUT)   per-head row blocks of Wo.T
      bo2    : (1, D_OUT)
    """
    scale = 1.0 / math.sqrt(HEAD_DIM)

    def per_head(w):  # (D_OUT, D_IN) -> (H, D_IN, HEAD_DIM), x @ W layout
        return w.T.reshape(D_IN, NUM_HEADS, HEAD_DIM).transpose(1, 0, 2)

    wqkv_h = jnp.concatenate(
        [per_head(wq * scale), per_head(wk), per_head(wv)], axis=0)   # (3H, D_IN, HD)
    wo_h = wo.T.reshape(NUM_HEADS, HEAD_DIM, D_OUT)                   # (H, HD, D_OUT)
    bo2 = bo.reshape(1, D_OUT)
    return wqkv_h, wo_h, bo2


@jax.jit
def multi_head_attention(x, wqkv_h, wo_h, bo2):
    b, t, d_in = x.shape
    assert (b, t, d_in) == (B, T, D_IN)
    x2 = x.reshape(B * T, D_IN)

    grid_spec = pltpu.PrefetchScalarGridSpec(
        num_scalar_prefetch=0,
        grid=(1,),                                       # whole-slab, single step
        in_specs=[
            pl.BlockSpec((B * T, D_IN), lambda i: (0, 0)),
            pl.BlockSpec((3 * NUM_HEADS, D_IN, HEAD_DIM), lambda i: (0, 0, 0)),
            pl.BlockSpec((NUM_HEADS, HEAD_DIM, D_OUT), lambda i: (0, 0, 0)),
            pl.BlockSpec((1, D_OUT), lambda i: (0, 0)),
        ],
        out_specs=pl.BlockSpec((B * T, D_OUT), lambda i: (0, 0)),
    )
    out = pl.pallas_call(
        _mha_kernel,
        out_shape=jax.ShapeDtypeStruct((B * T, D_OUT), jnp.float32),
        grid_spec=grid_spec,
        # Single grid step: semantics choice is moot here.  When work grows, add a
        # leading "parallel" axis so v7x shards it across its two TensorCores.
        compiler_params=pltpu.CompilerParams(dimension_semantics=("arbitrary",)),
    )(x2, wqkv_h, wo_h, bo2)
    return out.reshape(B, T, D_OUT)


def reference_mha(x, wq, wk, wv, wo, bo):
    """Pure-JAX replica of the PyTorch forward for verification."""
    b, t, _ = x.shape
    q = x @ wq.T
    k = x @ wk.T
    v = x @ wv.T
    q = q.reshape(b, t, NUM_HEADS, HEAD_DIM).transpose(0, 2, 1, 3)
    k = k.reshape(b, t, NUM_HEADS, HEAD_DIM).transpose(0, 2, 1, 3)
    v = v.reshape(b, t, NUM_HEADS, HEAD_DIM).transpose(0, 2, 1, 3)
    s = jnp.einsum("bhqd,bhkd->bhqk", q, k)
    mask = jnp.triu(jnp.ones((t, t), dtype=bool), k=1)
    s = jnp.where(mask[None, None], -jnp.inf, s)
    w = jax.nn.softmax(s / math.sqrt(HEAD_DIM), axis=-1)
    ctx = jnp.einsum("bhqk,bhkd->bhqd", w, v).transpose(0, 2, 1, 3).reshape(b, t, D_OUT)
    return ctx @ wo.T + bo


if __name__ == "__main__":
    key = jax.random.PRNGKey(0)
    kx, kq, kk, kv, ko, kb = jax.random.split(key, 6)

    x = jax.random.uniform(kx, (B, T, D_IN), dtype=jnp.float32)

    # Deterministic parameter init (nn.Linear-style uniform bounds).
    def lin_init(k, out_f, in_f):
        bound = 1.0 / math.sqrt(in_f)
        return jax.random.uniform(k, (out_f, in_f), jnp.float32, -bound, bound)

    wq = lin_init(kq, D_OUT, D_IN)
    wk = lin_init(kk, D_OUT, D_IN)
    wv = lin_init(kv, D_OUT, D_IN)
    wo = lin_init(ko, D_OUT, D_OUT)
    bo = jax.random.uniform(kb, (D_OUT,), jnp.float32,
                            -1.0 / math.sqrt(D_OUT), 1.0 / math.sqrt(D_OUT))

    # One-time weight prep (not on the per-call path).
    wqkv_h, wo_h, bo2 = prepare_mha_params(wq, wk, wv, wo, bo)
    wqkv_h, wo_h, bo2 = jax.block_until_ready((wqkv_h, wo_h, bo2))

    out = multi_head_attention(x, wqkv_h, wo_h, bo2)
    out = jax.block_until_ready(out)

    ref = reference_mha(x, wq, wk, wv, wo, bo)
    assert out.shape == (B, T, D_OUT)
    # Tolerance accommodates pl.reciprocal(approx=True) and reduction-order changes
    # from the per-head accumulation; errors remain well under 2e-3.
    assert jnp.allclose(out, ref, atol=2e-3, rtol=2e-3), "mismatch vs reference"

    print("KERNEL_OK")
</pallas_src>

<mosaic_0001>
module attributes {stable_mosaic.version = 11 : i64} {
  func.func @_mha_kernel(%arg0: i32, %arg1: memref<16x32xf32, #tpu.memory_space<vmem>>, %arg2: memref<12x32x8xf32, #tpu.memory_space<vmem>>, %arg3: memref<4x8x32xf32, #tpu.memory_space<vmem>>, %arg4: memref<1x32xf32, #tpu.memory_space<vmem>>, %arg5: memref<16x32xf32, #tpu.memory_space<vmem>>) attributes {dimension_semantics = [#tpu.dimension_semantics<arbitrary>], iteration_bounds = array<i64: 1>, scalar_prefetch = 0 : i64, scratch_operands = 0 : i64, tpu.core_type = #tpu.core_type<tc>, window_params = [{pipeline_mode = #tpu.pipeline_mode<synchronous>, transform_indices = @transform_0, window_bounds = array<i64: 16, 32>}, {pipeline_mode = #tpu.pipeline_mode<synchronous>, transform_indices = @transform_1, window_bounds = array<i64: 12, 32, 8>}, {pipeline_mode = #tpu.pipeline_mode<synchronous>, transform_indices = @transform_2, window_bounds = array<i64: 4, 8, 32>}, {pipeline_mode = #tpu.pipeline_mode<synchronous>, transform_indices = @transform_3, window_bounds = array<i64: 1, 32>}, {pipeline_mode = #tpu.pipeline_mode<synchronous>, transform_indices = @transform_4, window_bounds = array<i64: 16, 32>}]} {
    %c0 = arith.constant 0 : index
    %c0_0 = arith.constant 0 : index
    %0 = vector.load %arg1[%c0, %c0_0] : memref<16x32xf32, #tpu.memory_space<vmem>>, vector<16x32xf32>
    %1 = tpu.iota {dimensions = array<i32: 0>} : vector<8x8xi32>
    %2 = tpu.iota {dimensions = array<i32: 1>} : vector<8x8xi32>
    %3 = arith.cmpi sgt, %2, %1 : vector<8x8xi32>
    %4 = vector.shape_cast %3 : vector<8x8xi1> to vector<1x8x8xi1>
    %c0_1 = arith.constant 0 : index
    %c0_2 = arith.constant 0 : index
    %c0_3 = arith.constant 0 : index
    %5 = vector.load %arg2[%c0_1, %c0_2, %c0_3] : memref<12x32x8xf32, #tpu.memory_space<vmem>>, vector<1x32x8xf32>
    %6 = vector.shape_cast %5 : vector<1x32x8xf32> to vector<32x8xf32>
    %cst = arith.constant dense<0.000000e+00> : vector<16x8xf32>
    %7 = tpu.matmul %0, %6, %cst {dimension_numbers = #tpu.dot_dimension_numbers<[1], [0], [0], [1], [0, 0, 1, 1], [], []>} : vector<16x32xf32>, vector<32x8xf32>, vector<16x8xf32> -> vector<16x8xf32>
    %c4 = arith.constant 4 : index
    %c0_4 = arith.constant 0 : index
    %c0_5 = arith.constant 0 : index
    %8 = vector.load %arg2[%c4, %c0_4, %c0_5] : memref<12x32x8xf32, #tpu.memory_space<vmem>>, vector<1x32x8xf32>
    %9 = vector.shape_cast %8 : vector<1x32x8xf32> to vector<32x8xf32>
    %cst_6 = arith.constant dense<0.000000e+00> : vector<16x8xf32>
    %10 = tpu.matmul %0, %9, %cst_6 {dimension_numbers = #tpu.dot_dimension_numbers<[1], [0], [0], [1], [0, 0, 1, 1], [], []>} : vector<16x32xf32>, vector<32x8xf32>, vector<16x8xf32> -> vector<16x8xf32>
    %c8 = arith.constant 8 : index
    %c0_7 = arith.constant 0 : index
    %c0_8 = arith.constant 0 : index
    %11 = vector.load %arg2[%c8, %c0_7, %c0_8] : memref<12x32x8xf32, #tpu.memory_space<vmem>>, vector<1x32x8xf32>
    %12 = vector.shape_cast %11 : vector<1x32x8xf32> to vector<32x8xf32>
    %cst_9 = arith.constant dense<0.000000e+00> : vector<16x8xf32>
    %13 = tpu.matmul %0, %12, %cst_9 {dimension_numbers = #tpu.dot_dimension_numbers<[1], [0], [0], [1], [0, 0, 1, 1], [], []>} : vector<16x32xf32>, vector<32x8xf32>, vector<16x8xf32> -> vector<16x8xf32>
    %14 = vector.shape_cast %7 : vector<16x8xf32> to vector<2x8x8xf32>
    %15 = vector.shape_cast %10 : vector<16x8xf32> to vector<2x8x8xf32>
    %16 = vector.shape_cast %13 : vector<16x8xf32> to vector<2x8x8xf32>
    "tpu.trace_start"() <{level = 10 : i32, message = "bqd,bkd->bqk"}> : () -> ()
    %cst_10 = arith.constant dense<0.000000e+00> : vector<2x8x8xf32>
    %17 = tpu.matmul %14, %15, %cst_10 {dimension_numbers = #tpu.dot_dimension_numbers<[2], [2], [1], [1], [0, 0, 0, 1, 1, 1], [0], [0]>} : vector<2x8x8xf32>, vector<2x8x8xf32>, vector<2x8x8xf32> -> vector<2x8x8xf32>
    %cst_11 = arith.constant -1.000000e+30 : f32
    "tpu.trace_stop"() : () -> ()
    %18 = vector.shape_cast %4 : vector<1x8x8xi1> to vector<1x8x8xi1>
    %19 = vector.broadcast %18 : vector<1x8x8xi1> to vector<2x8x8xi1>
    %20 = vector.broadcast %cst_11 : f32 to vector<2x8x8xf32>
    %21 = arith.select %19, %20, %17 : vector<2x8x8xi1>, vector<2x8x8xf32>
    %cst_12 = arith.constant dense<0xFF800000> : vector<2x8xf32>
    %22 = vector.multi_reduction <maximumf>, %21, %cst_12 [2] : vector<2x8x8xf32> to vector<2x8xf32>
    %23 = vector.shape_cast %22 : vector<2x8xf32> to vector<2x8x1xf32>
    %24 = vector.broadcast %23 : vector<2x8x1xf32> to vector<2x8x8xf32>
    %25 = arith.subf %21, %24 : vector<2x8x8xf32>
    %26 = math.exp %25 : vector<2x8x8xf32>
    %cst_13 = arith.constant dense<0.000000e+00> : vector<2x8xf32>
    %27 = vector.multi_reduction <add>, %26, %cst_13 [2] : vector<2x8x8xf32> to vector<2x8xf32>
    %28 = vector.shape_cast %27 : vector<2x8xf32> to vector<2x8x1xf32>
    %29 = tpu.reciprocal %28 {approx = true} : vector<2x8x1xf32> -> vector<2x8x1xf32>
    %30 = vector.broadcast %29 : vector<2x8x1xf32> to vector<2x8x8xf32>
    %31 = arith.mulf %26, %30 : vector<2x8x8xf32>
    "tpu.trace_start"() <{level = 10 : i32, message = "bqk,bkd->bqd"}> : () -> ()
    %cst_14 = arith.constant dense<0.000000e+00> : vector<2x8x8xf32>
    %32 = tpu.matmul %31, %16, %cst_14 {dimension_numbers = #tpu.dot_dimension_numbers<[2], [1], [1], [2], [0, 0, 0, 1, 1, 2], [0], [0]>} : vector<2x8x8xf32>, vector<2x8x8xf32>, vector<2x8x8xf32> -> vector<2x8x8xf32>
    "tpu.trace_stop"() : () -> ()
    %33 = vector.shape_cast %32 : vector<2x8x8xf32> to vector<16x8xf32>
    %c0_15 = arith.constant 0 : index
    %c0_16 = arith.constant 0 : index
    %c0_17 = arith.constant 0 : index
    %34 = vector.load %arg3[%c0_15, %c0_16, %c0_17] : memref<4x8x32xf32, #tpu.memory_space<vmem>>, vector<1x8x32xf32>
    %35 = vector.shape_cast %34 : vector<1x8x32xf32> to vector<8x32xf32>
    %cst_18 = arith.constant dense<0.000000e+00> : vector<16x32xf32>
    %36 = tpu.matmul %33, %35, %cst_18 {dimension_numbers = #tpu.dot_dimension_numbers<[1], [0], [0], [1], [0, 0, 1, 1], [], []>} : vector<16x8xf32>, vector<8x32xf32>, vector<16x32xf32> -> vector<16x32xf32>
    %c1 = arith.constant 1 : index
    %c0_19 = arith.constant 0 : index
    %c0_20 = arith.constant 0 : index
    %37 = vector.load %arg2[%c1, %c0_19, %c0_20] : memref<12x32x8xf32, #tpu.memory_space<vmem>>, vector<1x32x8xf32>
    %38 = vector.shape_cast %37 : vector<1x32x8xf32> to vector<32x8xf32>
    %cst_21 = arith.constant dense<0.000000e+00> : vector<16x8xf32>
    %39 = tpu.matmul %0, %38, %cst_21 {dimension_numbers = #tpu.dot_dimension_numbers<[1], [0], [0], [1], [0, 0, 1, 1], [], []>} : vector<16x32xf32>, vector<32x8xf32>, vector<16x8xf32> -> vector<16x8xf32>
    %c5 = arith.constant 5 : index
    %c0_22 = arith.constant 0 : index
    %c0_23 = arith.constant 0 : index
    %40 = vector.load %arg2[%c5, %c0_22, %c0_23] : memref<12x32x8xf32, #tpu.memory_space<vmem>>, vector<1x32x8xf32>
    %41 = vector.shape_cast %40 : vector<1x32x8xf32> to vector<32x8xf32>
    %cst_24 = arith.constant dense<0.000000e+00> : vector<16x8xf32>
    %42 = tpu.matmul %0, %41, %cst_24 {dimension_numbers = #tpu.dot_dimension_numbers<[1], [0], [0], [1], [0, 0, 1, 1], [], []>} : vector<16x32xf32>, vector<32x8xf32>, vector<16x8xf32> -> vector<16x8xf32>
    %c9 = arith.constant 9 : index
    %c0_25 = arith.constant 0 : index
    %c0_26 = arith.constant 0 : index
    %43 = vector.load %arg2[%c9, %c0_25, %c0_26] : memref<12x32x8xf32, #tpu.memory_space<vmem>>, vector<1x32x8xf32>
    %44 = vector.shape_cast %43 : vector<1x32x8xf32> to vector<32x8xf32>
    %cst_27 = arith.constant dense<0.000000e+00> : vector<16x8xf32>
    %45 = tpu.matmul %0, %44, %cst_27 {dimension_numbers = #tpu.dot_dimension_numbers<[1], [0], [0], [1], [0, 0, 1, 1], [], []>} : vector<16x32xf32>, vector<32x8xf32>, vector<16x8xf32> -> vector<16x8xf32>
    %46 = vector.shape_cast %39 : vector<16x8xf32> to vector<2x8x8xf32>
    %47 = vector.shape_cast %42 : vector<16x8xf32> to vector<2x8x8xf32>
    %48 = vector.shape_cast %45 : vector<16x8xf32> to vector<2x8x8xf32>
    "tpu.trace_start"() <{level = 10 : i32, message = "bqd,bkd->bqk"}> : () -> ()
    %cst_28 = arith.constant dense<0.000000e+00> : vector<2x8x8xf32>
    %49 = tpu.matmul %46, %47, %cst_28 {dimension_numbers = #tpu.dot_dimension_numbers<[2], [2], [1], [1], [0, 0, 0, 1, 1, 1], [0], [0]>} : vector<2x8x8xf32>, vector<2x8x8xf32>, vector<2x8x8xf32> -> vector<2x8x8xf32>
    %cst_29 = arith.constant -1.000000e+30 : f32
    "tpu.trace_stop"() : () -> ()
    %50 = vector.shape_cast %4 : vector<1x8x8xi1> to vector<1x8x8xi1>
    %51 = vector.broadcast %50 : vector<1x8x8xi1> to vector<2x8x8xi1>
    %52 = vector.broadcast %cst_29 : f32 to vector<2x8x8xf32>
    %53 = arith.select %51, %52, %49 : vector<2x8x8xi1>, vector<2x8x8xf32>
    %cst_30 = arith.constant dense<0xFF800000> : vector<2x8xf32>
    %54 = vector.multi_reduction <maximumf>, %53, %cst_30 [2] : vector<2x8x8xf32> to vector<2x8xf32>
    %55 = vector.shape_cast %54 : vector<2x8xf32> to vector<2x8x1xf32>
    %56 = vector.broadcast %55 : vector<2x8x1xf32> to vector<2x8x8xf32>
    %57 = arith.subf %53, %56 : vector<2x8x8xf32>
    %58 = math.exp %57 : vector<2x8x8xf32>
    %cst_31 = arith.constant dense<0.000000e+00> : vector<2x8xf32>
    %59 = vector.multi_reduction <add>, %58, %cst_31 [2] : vector<2x8x8xf32> to vector<2x8xf32>
    %60 = vector.shape_cast %59 : vector<2x8xf32> to vector<2x8x1xf32>
    %61 = tpu.reciprocal %60 {approx = true} : vector<2x8x1xf32> -> vector<2x8x1xf32>
    %62 = vector.broadcast %61 : vector<2x8x1xf32> to vector<2x8x8xf32>
    %63 = arith.mulf %58, %62 : vector<2x8x8xf32>
    "tpu.trace_start"() <{level = 10 : i32, message = "bqk,bkd->bqd"}> : () -> ()
    %cst_32 = arith.constant dense<0.000000e+00> : vector<2x8x8xf32>
    %64 = tpu.matmul %63, %48, %cst_32 {dimension_numbers = #tpu.dot_dimension_numbers<[2], [1], [1], [2], [0, 0, 0, 1, 1, 2], [0], [0]>} : vector<2x8x8xf32>, vector<2x8x8xf32>, vector<2x8x8xf32> -> vector<2x8x8xf32>
    "tpu.trace_stop"() : () -> ()
    %65 = vector.shape_cast %64 : vector<2x8x8xf32> to vector<16x8xf32>
    %c1_33 = arith.constant 1 : index
    %c0_34 = arith.constant 0 : index
    %c0_35 = arith.constant 0 : index
    %66 = vector.load %arg3[%c1_33, %c0_34, %c0_35] : memref<4x8x32xf32, #tpu.memory_space<vmem>>, vector<1x8x32xf32>
    %67 = vector.shape_cast %66 : vector<1x8x32xf32> to vector<8x32xf32>
    %cst_36 = arith.constant dense<0.000000e+00> : vector<16x32xf32>
    %68 = tpu.matmul %65, %67, %cst_36 {dimension_numbers = #tpu.dot_dimension_numbers<[1], [0], [0], [1], [0, 0, 1, 1], [], []>} : vector<16x8xf32>, vector<8x32xf32>, vector<16x32xf32> -> vector<16x32xf32>
    %69 = arith.addf %36, %68 : vector<16x32xf32>
    %c2 = arith.constant 2 : index
    %c0_37 = arith.constant 0 : index
    %c0_38 = arith.constant 0 : index
    %70 = vector.load %arg2[%c2, %c0_37, %c0_38] : memref<12x32x8xf32, #tpu.memory_space<vmem>>, vector<1x32x8xf32>
    %71 = vector.shape_cast %70 : vector<1x32x8xf32> to vector<32x8xf32>
    %cst_39 = arith.constant dense<0.000000e+00> : vector<16x8xf32>
    %72 = tpu.matmul %0, %71, %cst_39 {dimension_numbers = #tpu.dot_dimension_numbers<[1], [0], [0], [1], [0, 0, 1, 1], [], []>} : vector<16x32xf32>, vector<32x8xf32>, vector<16x8xf32> -> vector<16x8xf32>
    %c6 = arith.constant 6 : index
    %c0_40 = arith.constant 0 : index
    %c0_41 = arith.constant 0 : index
    %73 = vector.load %arg2[%c6, %c0_40, %c0_41] : memref<12x32x8xf32, #tpu.memory_space<vmem>>, vector<1x32x8xf32>
    %74 = vector.shape_cast %73 : vector<1x32x8xf32> to vector<32x8xf32>
    %cst_42 = arith.constant dense<0.000000e+00> : vector<16x8xf32>
    %75 = tpu.matmul %0, %74, %cst_42 {dimension_numbers = #tpu.dot_dimension_numbers<[1], [0], [0], [1], [0, 0, 1, 1], [], []>} : vector<16x32xf32>, vector<32x8xf32>, vector<16x8xf32> -> vector<16x8xf32>
    %c10 = arith.constant 10 : index
    %c0_43 = arith.constant 0 : index
    %c0_44 = arith.constant 0 : index
    %76 = vector.load %arg2[%c10, %c0_43, %c0_44] : memref<12x32x8xf32, #tpu.memory_space<vmem>>, vector<1x32x8xf32>
    %77 = vector.shape_cast %76 : vector<1x32x8xf32> to vector<32x8xf32>
    %cst_45 = arith.constant dense<0.000000e+00> : vector<16x8xf32>
    %78 = tpu.matmul %0, %77, %cst_45 {dimension_numbers = #tpu.dot_dimension_numbers<[1], [0], [0], [1], [0, 0, 1, 1], [], []>} : vector<16x32xf32>, vector<32x8xf32>, vector<16x8xf32> -> vector<16x8xf32>
    %79 = vector.shape_cast %72 : vector<16x8xf32> to vector<2x8x8xf32>
    %80 = vector.shape_cast %75 : vector<16x8xf32> to vector<2x8x8xf32>
    %81 = vector.shape_cast %78 : vector<16x8xf32> to vector<2x8x8xf32>
    "tpu.trace_start"() <{level = 10 : i32, message = "bqd,bkd->bqk"}> : () -> ()
    %cst_46 = arith.constant dense<0.000000e+00> : vector<2x8x8xf32>
    %82 = tpu.matmul %79, %80, %cst_46 {dimension_numbers = #tpu.dot_dimension_numbers<[2], [2], [1], [1], [0, 0, 0, 1, 1, 1], [0], [0]>} : vector<2x8x8xf32>, vector<2x8x8xf32>, vector<2x8x8xf32> -> vector<2x8x8xf32>
    %cst_47 = arith.constant -1.000000e+30 : f32
    "tpu.trace_stop"() : () -> ()
    %83 = vector.shape_cast %4 : vector<1x8x8xi1> to vector<1x8x8xi1>
    %84 = vector.broadcast %83 : vector<1x8x8xi1> to vector<2x8x8xi1>
    %85 = vector.broadcast %cst_47 : f32 to vector<2x8x8xf32>
    %86 = arith.select %84, %85, %82 : vector<2x8x8xi1>, vector<2x8x8xf32>
    %cst_48 = arith.constant dense<0xFF800000> : vector<2x8xf32>
    %87 = vector.multi_reduction <maximumf>, %86, %cst_48 [2] : vector<2x8x8xf32> to vector<2x8xf32>
    %88 = vector.shape_cast %87 : vector<2x8xf32> to vector<2x8x1xf32>
    %89 = vector.broadcast %88 : vector<2x8x1xf32> to vector<2x8x8xf32>
    %90 = arith.subf %86, %89 : vector<2x8x8xf32>
    %91 = math.exp %90 : vector<2x8x8xf32>
    %cst_49 = arith.constant dense<0.000000e+00> : vector<2x8xf32>
    %92 = vector.multi_reduction <add>, %91, %cst_49 [2] : vector<2x8x8xf32> to vector<2x8xf32>
    %93 = vector.shape_cast %92 : vector<2x8xf32> to vector<2x8x1xf32>
    %94 = tpu.reciprocal %93 {approx = true} : vector<2x8x1xf32> -> vector<2x8x1xf32>
    %95 = vector.broadcast %94 : vector<2x8x1xf32> to vector<2x8x8xf32>
    %96 = arith.mulf %91, %95 : vector<2x8x8xf32>
    "tpu.trace_start"() <{level = 10 : i32, message = "bqk,bkd->bqd"}> : () -> ()
    %cst_50 = arith.constant dense<0.000000e+00> : vector<2x8x8xf32>
    %97 = tpu.matmul %96, %81, %cst_50 {dimension_numbers = #tpu.dot_dimension_numbers<[2], [1], [1], [2], [0, 0, 0, 1, 1, 2], [0], [0]>} : vector<2x8x8xf32>, vector<2x8x8xf32>, vector<2x8x8xf32> -> vector<2x8x8xf32>
    "tpu.trace_stop"() : () -> ()
    %98 = vector.shape_cast %97 : vector<2x8x8xf32> to vector<16x8xf32>
    %c2_51 = arith.constant 2 : index
    %c0_52 = arith.constant 0 : index
    %c0_53 = arith.constant 0 : index
    %99 = vector.load %arg3[%c2_51, %c0_52, %c0_53] : memref<4x8x32xf32, #tpu.memory_space<vmem>>, vector<1x8x32xf32>
    %100 = vector.shape_cast %99 : vector<1x8x32xf32> to vector<8x32xf32>
    %cst_54 = arith.constant dense<0.000000e+00> : vector<16x32xf32>
    %101 = tpu.matmul %98, %100, %cst_54 {dimension_numbers = #tpu.dot_dimension_numbers<[1], [0], [0], [1], [0, 0, 1, 1], [], []>} : vector<16x8xf32>, vector<8x32xf32>, vector<16x32xf32> -> vector<16x32xf32>
    %102 = arith.addf %69, %101 : vector<16x32xf32>
    %c3 = arith.constant 3 : index
    %c0_55 = arith.constant 0 : index
    %c0_56 = arith.constant 0 : index
    %103 = vector.load %arg2[%c3, %c0_55, %c0_56] : memref<12x32x8xf32, #tpu.memory_space<vmem>>, vector<1x32x8xf32>
    %104 = vector.shape_cast %103 : vector<1x32x8xf32> to vector<32x8xf32>
    %cst_57 = arith.constant dense<0.000000e+00> : vector<16x8xf32>
    %105 = tpu.matmul %0, %104, %cst_57 {dimension_numbers = #tpu.dot_dimension_numbers<[1], [0], [0], [1], [0, 0, 1, 1], [], []>} : vector<16x32xf32>, vector<32x8xf32>, vector<16x8xf32> -> vector<16x8xf32>
    %c7 = arith.constant 7 : index
    %c0_58 = arith.constant 0 : index
    %c0_59 = arith.constant 0 : index
    %106 = vector.load %arg2[%c7, %c0_58, %c0_59] : memref<12x32x8xf32, #tpu.memory_space<vmem>>, vector<1x32x8xf32>
    %107 = vector.shape_cast %106 : vector<1x32x8xf32> to vector<32x8xf32>
    %cst_60 = arith.constant dense<0.000000e+00> : vector<16x8xf32>
    %108 = tpu.matmul %0, %107, %cst_60 {dimension_numbers = #tpu.dot_dimension_numbers<[1], [0], [0], [1], [0, 0, 1, 1], [], []>} : vector<16x32xf32>, vector<32x8xf32>, vector<16x8xf32> -> vector<16x8xf32>
    %c11 = arith.constant 11 : index
    %c0_61 = arith.constant 0 : index
    %c0_62 = arith.constant 0 : index
    %109 = vector.load %arg2[%c11, %c0_61, %c0_62] : memref<12x32x8xf32, #tpu.memory_space<vmem>>, vector<1x32x8xf32>
    %110 = vector.shape_cast %109 : vector<1x32x8xf32> to vector<32x8xf32>
    %cst_63 = arith.constant dense<0.000000e+00> : vector<16x8xf32>
    %111 = tpu.matmul %0, %110, %cst_63 {dimension_numbers = #tpu.dot_dimension_numbers<[1], [0], [0], [1], [0, 0, 1, 1], [], []>} : vector<16x32xf32>, vector<32x8xf32>, vector<16x8xf32> -> vector<16x8xf32>
    %112 = vector.shape_cast %105 : vector<16x8xf32> to vector<2x8x8xf32>
    %113 = vector.shape_cast %108 : vector<16x8xf32> to vector<2x8x8xf32>
    %114 = vector.shape_cast %111 : vector<16x8xf32> to vector<2x8x8xf32>
    "tpu.trace_start"() <{level = 10 : i32, message = "bqd,bkd->bqk"}> : () -> ()
    %cst_64 = arith.constant dense<0.000000e+00> : vector<2x8x8xf32>
    %115 = tpu.matmul %112, %113, %cst_64 {dimension_numbers = #tpu.dot_dimension_numbers<[2], [2], [1], [1], [0, 0, 0, 1, 1, 1], [0], [0]>} : vector<2x8x8xf32>, vector<2x8x8xf32>, vector<2x8x8xf32> -> vector<2x8x8xf32>
    %cst_65 = arith.constant -1.000000e+30 : f32
    "tpu.trace_stop"() : () -> ()
    %116 = vector.shape_cast %4 : vector<1x8x8xi1> to vector<1x8x8xi1>
    %117 = vector.broadcast %116 : vector<1x8x8xi1> to vector<2x8x8xi1>
    %118 = vector.broadcast %cst_65 : f32 to vector<2x8x8xf32>
    %119 = arith.select %117, %118, %115 : vector<2x8x8xi1>, vector<2x8x8xf32>
    %cst_66 = arith.constant dense<0xFF800000> : vector<2x8xf32>
    %120 = vector.multi_reduction <maximumf>, %119, %cst_66 [2] : vector<2x8x8xf32> to vector<2x8xf32>
    %121 = vector.shape_cast %120 : vector<2x8xf32> to vector<2x8x1xf32>
    %122 = vector.broadcast %121 : vector<2x8x1xf32> to vector<2x8x8xf32>
    %123 = arith.subf %119, %122 : vector<2x8x8xf32>
    %124 = math.exp %123 : vector<2x8x8xf32>
    %cst_67 = arith.constant dense<0.000000e+00> : vector<2x8xf32>
    %125 = vector.multi_reduction <add>, %124, %cst_67 [2] : vector<2x8x8xf32> to vector<2x8xf32>
    %126 = vector.shape_cast %125 : vector<2x8xf32> to vector<2x8x1xf32>
    %127 = tpu.reciprocal %126 {approx = true} : vector<2x8x1xf32> -> vector<2x8x1xf32>
    %128 = vector.broadcast %127 : vector<2x8x1xf32> to vector<2x8x8xf32>
    %129 = arith.mulf %124, %128 : vector<2x8x8xf32>
    "tpu.trace_start"() <{level = 10 : i32, message = "bqk,bkd->bqd"}> : () -> ()
    %cst_68 = arith.constant dense<0.000000e+00> : vector<2x8x8xf32>
    %130 = tpu.matmul %129, %114, %cst_68 {dimension_numbers = #tpu.dot_dimension_numbers<[2], [1], [1], [2], [0, 0, 0, 1, 1, 2], [0], [0]>} : vector<2x8x8xf32>, vector<2x8x8xf32>, vector<2x8x8xf32> -> vector<2x8x8xf32>
    "tpu.trace_stop"() : () -> ()
    %131 = vector.shape_cast %130 : vector<2x8x8xf32> to vector<16x8xf32>
    %c3_69 = arith.constant 3 : index
    %c0_70 = arith.constant 0 : index
    %c0_71 = arith.constant 0 : index
    %132 = vector.load %arg3[%c3_69, %c0_70, %c0_71] : memref<4x8x32xf32, #tpu.memory_space<vmem>>, vector<1x8x32xf32>
    %133 = vector.shape_cast %132 : vector<1x8x32xf32> to vector<8x32xf32>
    %cst_72 = arith.constant dense<0.000000e+00> : vector<16x32xf32>
    %134 = tpu.matmul %131, %133, %cst_72 {dimension_numbers = #tpu.dot_dimension_numbers<[1], [0], [0], [1], [0, 0, 1, 1], [], []>} : vector<16x8xf32>, vector<8x32xf32>, vector<16x32xf32> -> vector<16x32xf32>
    %135 = arith.addf %102, %134 : vector<16x32xf32>
    %c0_73 = arith.constant 0 : index
    %c0_74 = arith.constant 0 : index
    %136 = vector.load %arg4[%c0_73, %c0_74] : memref<1x32xf32, #tpu.memory_space<vmem>>, vector<1x32xf32>
    %137 = vector.broadcast %136 : vector<1x32xf32> to vector<16x32xf32>
    %138 = arith.addf %135, %137 : vector<16x32xf32>
    %c0_75 = arith.constant 0 : index
    %c0_76 = arith.constant 0 : index
    %139 = vector.load %arg5[%c0_75, %c0_76] : memref<16x32xf32, #tpu.memory_space<vmem>>, vector<16x32xf32>
    tpu.vector_store %arg5[%c0_75, %c0_76], %138 {strides = array<i32>} : memref<16x32xf32, #tpu.memory_space<vmem>>, vector<16x32xf32>,
    return
  }
  func.func @transform_0(%arg0: i32) -> (i32, i32) {
    %c0_i32 = arith.constant 0 : i32
    %c0_i32_0 = arith.constant 0 : i32
    %c0_i32_1 = arith.constant 0 : i32
    return %c0_i32, %c0_i32_0 : i32, i32
  }
  func.func @transform_1(%arg0: i32) -> (i32, i32, i32) {
    %c0_i32 = arith.constant 0 : i32
    %c0_i32_0 = arith.constant 0 : i32
    %c0_i32_1 = arith.constant 0 : i32
    %c0_i32_2 = arith.constant 0 : i32
    return %c0_i32, %c0_i32_0, %c0_i32_1 : i32, i32, i32
  }
  func.func @transform_2(%arg0: i32) -> (i32, i32, i32) {
    %c0_i32 = arith.constant 0 : i32
    %c0_i32_0 = arith.constant 0 : i32
    %c0_i32_1 = arith.constant 0 : i32
    %c0_i32_2 = arith.constant 0 : i32
    return %c0_i32, %c0_i32_0, %c0_i32_1 : i32, i32, i32
  }
  func.func @transform_3(%arg0: i32) -> (i32, i32) {
    %c0_i32 = arith.constant 0 : i32
    %c0_i32_0 = arith.constant 0 : i32
    %c0_i32_1 = arith.constant 0 : i32
    return %c0_i32, %c0_i32_0 : i32, i32
  }
  func.func @transform_4(%arg0: i32) -> (i32, i32) {
    %c0_i32 = arith.constant 0 : i32
    %c0_i32_0 = arith.constant 0 : i32
    %c0_i32_1 = arith.constant 0 : i32
    return %c0_i32, %c0_i32_0 : i32, i32
  }
}

</mosaic_0001>

<bundles_post_ra>
// kernel: multi_head_attention.1
= control target key start
LH: loop header
LB: loop body
LE: loop exit
PB: predicated region body
PF: predicated region fallthrough
CT: control target
= control target key end

     0   :  { %s1504_s0 = inlined_call_operand.vmem [shape: f32[16,32], index: 0, kind: input, shape index: {}]   ;;  %s1505_s1 = inlined_call_operand.vmem [shape: f32[12,32,8], index: 1, kind: input, shape index: {}]   ;;  %s1506_s2 = inlined_call_operand.vmem [shape: f32[4,8,32], index: 2, kind: input, shape index: {}]   ;;  %s1507_s3 = inlined_call_operand.vmem [shape: f32[1,32], index: 3, kind: input, shape index: {}]   ;;  %s1508_s4 = inlined_call_operand.hbm [shape: f32[16,32], index: 4, kind: output, shape index: {}]  }
   0x1   :  { %v1016_v0 = vld [vmem:[%s1505_s1 + $0x98] sm:$0xff]  ;;  %v1015_v1 = vld [vmem:[%s1505_s1 + $0x90] sm:$0xff]  ;;  %v1014_v4 = vld [vmem:[%s1505_s1 + $0x88] sm:$0xff] }
   0x2   :  { %v28_v2 = vld [vmem:[%s1505_s1 + $0x18] sm:$0xff]  ;;  %76 = vmatpush.msra.mxu1 %v1016_v0  ;;  %1114 = vmatpush.msra.mxu2 %v1016_v0  ;;  %v27_v3 = vld [vmem:[%s1505_s1 + $0x10] sm:$0xff]  ;;  %v26_v5 = vld [vmem:[%s1505_s1 + $0x8] sm:$0xff] }
   0x3   :  { %48 = vmatpush.msra.mxu0 %v28_v2 }
   0x4   :  { %77 = vmatpush.msra.mxu1 %v1015_v1  ;;  %1115 = vmatpush.msra.mxu2 %v1015_v1 }
   0x5   :  { %9 = vsyncpa [#allocation3], 0  ;;  %49 = vmatpush.msra.mxu0 %v27_v3  ;;  %v1013_v6 = vld [vmem:[%s1505_s1 + $0x80] sm:$0xff]  ;;  %vm29_vm0 = vcmask 261120   ;;  %v1240_v9 = vld [vmem:[%s1504_s0 + $0x8] sm:$0xff]  ;;  %vm115_vm1 = vcmask 64512   ;;  %v20_v17 = vlaneseq }
   0x6   :  { %78 = vmatpush.msra.mxu1 %v1014_v4  ;;  %1116 = vmatpush.msra.mxu2 %v1014_v4  ;;  %v1232_v7 = vld [vmem:[%s1504_s0] sm:$0xff]  ;;  %v1022_v14 = vld [vmem:[%s1505_s1 + $0x118] sm:$0xff]  ;;  %v1021_v15 = vld [vmem:[%s1505_s1 + $0x110] sm:$0xff]  ;;  %s1180_s16 = smov [#allocation2]   ;;  %s999_s19 = sshll.u32 %s1508_s4, 4  ;;  %s1000_s19 = int_to_ptr.hbm [resolvable:$true] %s999_s19 }
   0x7   :  { %v25_v8 = vld [vmem:[%s1505_s1] sm:$0xff]  ;;  %50 = vmatpush.msra.mxu0 %v26_v5  ;;  %v1020_v16 = vld [vmem:[%s1505_s1 + $0x108] sm:$0xff]  ;;  %v21_v18 = vshrl.u32 %v20_v17, 7  ;;  %v23_v19 = vand.u32 127, %v20_v17  ;;  %v1040_v28 = vld [vmem:[%s1505_s1 + $0xb8] sm:$0xff]  ;;  %s997_s17 = sshll.u32 %s1180_s16, 4  ;;  %s998_s17 = int_to_ptr.vmem [resolvable:$true] %s997_s17 }
   0x8   :  { %79 = vmatpush.msra.mxu1 %v1013_v6  ;;  %1117 = vmatpush.msra.mxu2 %v1013_v6  ;;  %v1019_v27 = vld [vmem:[%s1505_s1 + $0x100] sm:$0xff]  ;;  %v1039_v29 = vld [vmem:[%s1505_s1 + $0xb0] sm:$0xff]  ;;  %v1038_v30 = vld [vmem:[%s1505_s1 + $0xa8] sm:$0xff]  ;;  %s1181_s20 = smov 128  }
   0x9   :  { %1017 = vmatmul.msk.f32.vlgmr.msra.gmra.mxu1 %vm29_vm0, %v1232_v7  ;;  %51 = vmatpush.msra.mxu0 %v25_v8  ;;  %vm1263_vm2 = vcmp.gt.s32.totalorder %v23_v19, %v21_v18  ;;  %v1034_v31 = vld [vmem:[%s1505_s1 + $0x38] sm:$0xff]  ;;  %v1037_v32 = vld [vmem:[%s1505_s1 + $0xa0] sm:$0xff]  ;;  %v1033_v33 = vld [vmem:[%s1505_s1 + $0x30] sm:$0xff] }
   0xa   :  { %1018 = vmatmul.msk.f32.vlgmr.msra.gmra.mxu2 %vm29_vm0, %v1240_v9  ;;  %1011 = vmatmul.msk.f32.vlgmr.msra.gmra.mxu0 %vm29_vm0, %v1232_v7  ;;  %v1032_v34 = vld [vmem:[%s1505_s1 + $0x28] sm:$0xff]  ;;  %v1031_v35 = vld [vmem:[%s1505_s1 + $0x20] sm:$0xff]  ;;  %v1046_v59 = vld [vmem:[%s1505_s1 + $0x138] sm:$0xff] }
   0xb   :  { %104 = vmatpush.msrb.mxu2 %v1022_v14  ;;  %258 = vmatpush.msrb.mxu1 %v1034_v31  ;;  %v240_v58 = vld [vmem:[%s1506_s2] sm:$0xff]  ;;  %v1045_v60 = vld [vmem:[%s1505_s1 + $0x130] sm:$0xff]  ;;  %v1044_v5 = vld [vmem:[%s1505_s1 + $0x128] sm:$0xff] }
   0xc   :  { %v1043_v6 = vld [vmem:[%s1505_s1 + $0x120] sm:$0xff] }
   0xd   :  { %105 = vmatpush.msrb.mxu2 %v1021_v15  ;;  %259 = vmatpush.msrb.mxu1 %v1033_v33  ;;  %v1099_v20 = vld [vmem:[%s1505_s1 + $0x160] sm:$0xff] }
   0xf   :  { %106 = vmatpush.msrb.mxu2 %v1020_v16  ;;  %260 = vmatpush.msrb.mxu1 %v1032_v34 }
  0x11   :  { %107 = vmatpush.msrb.mxu2 %v1019_v27  ;;  %261 = vmatpush.msrb.mxu1 %v1031_v35  ;;  %v1062_v27 = vld [vmem:[%s1505_s1 + $0x50] sm:$0xff] }
  0x12   :  { %1012 = vmatmul.msk.f32.gmra.mxu0 %vm29_vm0, %v1240_v9  ;;  %1023 = vmatmul.msk.f32.vlgmr.msrb.gmra.mxu2 %vm29_vm0, %v1232_v7 }
  0x13   :  { %286 = vmatpush.msra.mxu2 %v1040_v28  ;;  %1035 = vmatmul.msk.f32.vlgmr.msrb.gmra.mxu1 %vm29_vm0, %v1232_v7  ;;  %v1061_v28 = vld [vmem:[%s1505_s1 + $0x48] sm:$0xff] }
  0x15   :  { %287 = vmatpush.msra.mxu2 %v1039_v29  ;;  %v1060_v29 = vld [vmem:[%s1505_s1 + $0x40] sm:$0xff] }
  0x17   :  { %288 = vmatpush.msra.mxu2 %v1038_v30 }
  0x19   :  { %289 = vmatpush.msra.mxu2 %v1037_v32 }
  0x1a   :  { %1024 = vmatmul.msk.f32.gmra.mxu2 %vm29_vm0, %v1240_v9 }
  0x1b   :  { %1036 = vmatmul.msk.f32.gmra.mxu1 %vm29_vm0, %v1240_v9 }
  0x22   :  { %1041 = vmatmul.msk.f32.vlgmr.msra.gmra.mxu2 %vm29_vm0, %v1232_v7 }
  0x2a   :  { %1042 = vmatmul.msk.f32.gmra.mxu2 %vm29_vm0, %v1240_v9 }
  0x86   :  { %v81_v10 = vpop.f32.mrf.mxu1 }
  0x87   :  { %1025 = vmatpush.xpose.msk.msra.mxu3 %vm115_vm1, %v81_v10  ;;  %v53_v11 = vpop.f32.mrf.mxu0 }
  0x8a   :  { %1026 = vmatmul.msk.f32.vlgmr.msra.gmra.mxu3 %vm115_vm1, %v53_v11 }
  0x8d   :  { %v84_v12 = vpop.f32.mrf.mxu2 }
  0x8e   :  { %1027 = vmatpush.xpose.msk.msrb.mxu3 %vm115_vm1, %v84_v12 }
  0x8f   :  { %v56_v13 = vpop.f32.mrf.mxu0 }
  0x90   :  { %v263_v56 = vpop.f32.mrf.mxu1 }
  0x92   :  { %1028 = vmatmul.msk.f32.vlgmr.msrb.gmra.mxu3 %vm115_vm1, %v56_v13 }
  0x95   :  { %v109_v46 = vpop.f32.mrf.mxu2 }
  0x96   :  { %212 = vmatpush.msra.mxu3 %v109_v46 }
  0x98   :  { %v266_v57 = vpop.f32.mrf.mxu1  ;;  %314 = vmatpush.msrb.mxu3 %v1046_v59 }
  0x9a   :  { %315 = vmatpush.msrb.mxu3 %v1045_v60 }
  0x9c   :  { %316 = vmatpush.msrb.mxu3 %v1044_v5  ;;  %v1095_v5 = vld [vmem:[%s1505_s1 + $0xf0] sm:$0xff] }
  0x9d   :  { %v112_v47 = vpop.f32.mrf.mxu2 }
  0x9e   :  { %235 = vmatpush.msrb.mxu0 %v112_v47  ;;  %317 = vmatpush.msrb.mxu3 %v1043_v6  ;;  %v1090_v6 = vld [vmem:[%s1505_s1 + $0x78] sm:$0xff] }
  0xa5   :  { %v291_v48 = vpop.f32.mrf.mxu2 }
  0xa6   :  { %1049 = vmatpush.xpose.msk.msra.mxu0 %vm115_vm1, %v291_v48 }
  0xad   :  { %v294_v55 = vpop.f32.mrf.mxu2 }
 0x10d   :  { %v139_v21 = vpop.f32.mrf.mxu3 }
 0x10e   :  { %v170_v22 = vsel %vm1263_vm2, -1e+30, %v139_v21 }
 0x10f   :  { %v172_v23 = vsel %vm115_vm1, %v170_v22, -inf }
 0x110   :  { %173 = vmax.xlane.f32.xlu1 %v172_v23  ;;  %v1068_v23 = vld [vmem:[%s1505_s1 + $0xd0] sm:$0xff] }
 0x115   :  { %v165_v24 = vpop.f32.mrf.mxu3 }
 0x116   :  { %v171_v25 = vsel %vm1263_vm2, -1e+30, %v165_v24  ;;  %v1067_v24 = vld [vmem:[%s1505_s1 + $0xc8] sm:$0xff] }
 0x117   :  { %v175_v26 = vsel %vm115_vm1, %v171_v25, -inf }
 0x118   :  { %176 = vmax.xlane.f32.xlu0 %v175_v26  ;;  %v1063_v26 = vld [vmem:[%s1505_s1 + $0x58] sm:$0xff] }
 0x183   :  { %v174_v36 = vpop.xlane.xlu1 %173 }
 0x184   :  { %v178_v37 = vsub.f32 %v170_v22, %v174_v36  ;;  %v1069_v22 = vld [vmem:[%s1505_s1 + $0xd8] sm:$0xff]  ;;  %v1055_v36 = vld [vmem:[%s1506_s2 + $0x8] sm:$0xff] }
 0x186   :  { %v180_v38 = vmul.f32 1.442695, %v178_v37 }
 0x188   :  { %1122 = vpow2.f32 %v180_v38 }
 0x18b   :  { %v177_v39 = vpop.xlane.xlu0 %176 }
 0x18c   :  { %v179_v40 = vsub.f32 %v171_v25, %v177_v39  ;;  %v1066_v25 = vld [vmem:[%s1505_s1 + $0xc0] sm:$0xff] }
 0x18e   :  { %v1123_v41 = vpop.eup %1122  ;;  %v182_v42 = vmul.f32 1.442695, %v179_v40 }
 0x18f   :  { %v184_v43 = vsel %vm115_vm1, %v1123_v41, 0.0 }
 0x190   :  { %1124 = vpow2.f32 %v182_v42  ;;  %185 = vadd.xlane.f32.xlu1 %v184_v43  ;;  %v1075_v43 = vld [vmem:[%s1505_s1 + $0x158] sm:$0xff] }
 0x196   :  { %v1125_v44 = vpop.eup %1124 }
 0x197   :  { %v187_v45 = vsel %vm115_vm1, %v1125_v44, 0.0 }
 0x198   :  { %188 = vadd.xlane.f32.xlu0 %v187_v45  ;;  %v1073_v45 = vld [vmem:[%s1505_s1 + $0x148] sm:$0xff] }
 0x203   :  { %v186_v49 = vpop.xlane.xlu1 %185 }
 0x204   :  { %1126 = vrcp.f32 %v186_v49 }
 0x20a   :  { %v1127_v50 = vpop.eup %1126 }
 0x20b   :  { %v192_v51 = vmul.f32 %v1127_v50, %v1123_v41  ;;  %v189_v52 = vpop.xlane.xlu0 %188 }
 0x20c   :  { %1128 = vrcp.f32 %v189_v52 }
 0x20d   :  { %1029 = vmatmul.msk.f32.vlgmr.msra.gmra.mxu3 %vm115_vm1, %v192_v51 }
 0x20e   :  { %470 = vmatpush.msra.mxu3 %v1055_v36 }
 0x212   :  { %v1129_v53 = vpop.eup %1128 }
 0x213   :  { %v193_v54 = vmul.f32 %v1129_v53, %v1125_v44  ;;  %v1074_v44 = vld [vmem:[%s1505_s1 + $0x150] sm:$0xff] }
 0x215   :  { %1030 = vmatmul.msk.f32.vlgmr.msrb.gmra.mxu0 %vm115_vm1, %v193_v54  ;;  %1047 = vmatmul.msk.f32.vlgmr.msrb.gmra.mxu3 %vm29_vm0, %v1232_v7  ;;  %v1072_v54 = vld [vmem:[%s1505_s1 + $0x140] sm:$0xff] }
 0x216   :  { %1051 = vmatpush.xpose.msk.msrb.mxu0 %vm115_vm1, %v294_v55  ;;  %580 = vmatpush.msrb.mxu3 %v1075_v43  ;;  %v1100_v43 = vld [vmem:[%s1505_s1 + $0x168] sm:$0xff] }
 0x218   :  { %581 = vmatpush.msrb.mxu3 %v1074_v44 }
 0x21a   :  { %582 = vmatpush.msrb.mxu3 %v1073_v45 }
 0x21c   :  { %583 = vmatpush.msrb.mxu3 %v1072_v54 }
 0x21d   :  { %1050 = vmatmul.msk.f32.vlgmr.msra.gmra.mxu0 %vm115_vm1, %v263_v56  ;;  %1048 = vmatmul.msk.f32.gmra.mxu3 %vm29_vm0, %v1240_v9 }
 0x21e   :  { %499 = vmatpush.msra.mxu0 %v240_v58 }
 0x225   :  { %1052 = vmatmul.msk.f32.vlgmr.msrb.gmra.mxu0 %vm115_vm1, %v266_v57 }
 0x290   :  { %v214_v61 = vpop.f32.mrf.mxu3 }
 0x291   :  { %1058 = vmatmul.msk.f32.vlgmr.msra.gmra.mxu0 %vm115_vm1, %v214_v61 }
 0x292   :  { %v237_v62 = vpop.f32.mrf.mxu0 }
 0x298   :  { %v319_v19 = vpop.f32.mrf.mxu3 }
 0x299   :  { %1059 = vmatmul.msk.f32.gmra.mxu0 %vm115_vm1, %v237_v62  ;;  %419 = vmatpush.msra.mxu1 %v319_v19 }
 0x29a   :  { %v348_v63 = vpop.f32.mrf.mxu0 }
 0x29b   :  { %v377_v3 = vsel %vm1263_vm2, -1e+30, %v348_v63  ;;  %524 = vmatpush.msrb.mxu1 %v1063_v26 }
 0x29c   :  { %v379_v4 = vsel %vm115_vm1, %v377_v3, -inf }
 0x29d   :  { %525 = vmatpush.msrb.mxu1 %v1062_v27 }
 0x29f   :  { %526 = vmatpush.msrb.mxu1 %v1061_v28 }
 0x2a0   :  { %v322_v21 = vpop.f32.mrf.mxu3 }
 0x2a1   :  { %442 = vmatpush.msrb.mxu2 %v322_v21  ;;  %527 = vmatpush.msrb.mxu1 %v1060_v29 }
 0x2a2   :  { %v374_v0 = vpop.f32.mrf.mxu0 }
 0x2a3   :  { %v378_v1 = vsel %vm1263_vm2, -1e+30, %v374_v0  ;;  %552 = vmatpush.msra.mxu2 %v1069_v22  ;;  %v1084_v22 = vld [vmem:[%s1506_s2 + $0x10] sm:$0xff] }
 0x2a4   :  { %v382_v2 = vsel %vm115_vm1, %v378_v1, -inf }
 0x2a5   :  { %383 = vmax.xlane.f32.xlu2 %v382_v2  ;;  %553 = vmatpush.msra.mxu2 %v1068_v23 }
 0x2a7   :  { %554 = vmatpush.msra.mxu2 %v1067_v24 }
 0x2a9   :  { %555 = vmatpush.msra.mxu2 %v1066_v25 }
 0x2ad   :  { %380 = vmax.xlane.f32.xlu2 %v379_v4 }
 0x30e   :  { %v1401_v46 = vpop.f32.mrf.mxu0 }
 0x316   :  { %v1403_v47 = vpop.f32.mrf.mxu0 }
 0x318   :  { %v384_v8 = vpop.xlane.xlu2 %383 }
 0x319   :  { %v386_v10 = vsub.f32 %v378_v1, %v384_v8  ;;  %v1094_v8 = vld [vmem:[%s1505_s1 + $0xe8] sm:$0xff] }
 0x31b   :  { %v389_v11 = vmul.f32 1.442695, %v386_v10  ;;  %v1089_v10 = vld [vmem:[%s1505_s1 + $0x70] sm:$0xff] }
 0x31d   :  { %1130 = vpow2.f32 %v389_v11  ;;  %v1093_v11 = vld [vmem:[%s1505_s1 + $0xe0] sm:$0xff] }
 0x320   :  { %v381_v12 = vpop.xlane.xlu2 %380 }
 0x321   :  { %v385_v13 = vsub.f32 %v377_v3, %v381_v12  ;;  %v1096_v3 = vld [vmem:[%s1505_s1 + $0xf8] sm:$0xff]  ;;  %v1088_v12 = vld [vmem:[%s1505_s1 + $0x68] sm:$0xff] }
 0x323   :  { %v1131_v14 = vpop.eup %1130  ;;  %v387_v15 = vmul.f32 1.442695, %v385_v13 }
 0x324   :  { %v394_v16 = vsel %vm115_vm1, %v1131_v14, 0.0 }
 0x325   :  { %1132 = vpow2.f32 %v387_v15  ;;  %395 = vadd.xlane.f32.xlu0 %v394_v16 }
 0x32b   :  { %v1133_v17 = vpop.eup %1132 }
 0x32c   :  { %v391_v18 = vsel %vm115_vm1, %v1133_v17, 0.0 }
 0x32d   :  { %392 = vadd.xlane.f32.xlu1 %v391_v18 }
 0x398   :  { %v396_v30 = vpop.xlane.xlu0 %395 }
 0x399   :  { %1134 = vrcp.f32 %v396_v30 }
 0x39f   :  { %v1135_v31 = vpop.eup %1134 }
 0x3a0   :  { %v400_v32 = vmul.f32 %v1135_v31, %v1131_v14  ;;  %v393_v33 = vpop.xlane.xlu1 %392  ;;  %v1087_v14 = vld [vmem:[%s1505_s1 + $0x60] sm:$0xff] }
 0x3a1   :  { %1136 = vrcp.f32 %v393_v33 }
 0x3a2   :  { %1054 = vmatmul.msk.f32.vlgmr.msrb.gmra.mxu2 %vm115_vm1, %v400_v32 }
 0x3a7   :  { %v1137_v34 = vpop.eup %1136 }
 0x3a8   :  { %v399_v35 = vmul.f32 %v1137_v34, %v1133_v17 }
 0x3aa   :  { %1053 = vmatmul.msk.f32.vlgmr.msra.gmra.mxu1 %vm115_vm1, %v399_v35  ;;  %1070 = vmatmul.msk.f32.vlgmr.msra.gmra.mxu2 %vm29_vm0, %v1232_v7 }
 0x3b2   :  { %1071 = vmatmul.msk.f32.gmra.mxu2 %vm29_vm0, %v1240_v9  ;;  %1064 = vmatmul.msk.f32.vlgmr.msrb.gmra.mxu1 %vm29_vm0, %v1232_v7 }
 0x3ba   :  { %1065 = vmatmul.msk.f32.gmra.mxu1 %vm29_vm0, %v1240_v9 }
 0x425   :  { %v444_v37 = vpop.f32.mrf.mxu2 }
 0x427   :  { %v421_v38 = vpop.f32.mrf.mxu1 }
 0x428   :  { %1056 = vmatmul.msk.f32.vlgmr.msra.gmra.mxu3 %vm115_vm1, %v421_v38 }
 0x429   :  { %791 = vmatpush.msra.mxu3 %v1096_v3 }
 0x42b   :  { %792 = vmatpush.msra.mxu3 %v1095_v5 }
 0x42d   :  { %v557_v39 = vpop.f32.mrf.mxu2  ;;  %793 = vmatpush.msra.mxu3 %v1094_v8 }
 0x42e   :  { %1078 = vmatpush.xpose.msk.msrb.mxu0 %vm115_vm1, %v557_v39 }
 0x42f   :  { %v529_v40 = vpop.f32.mrf.mxu1  ;;  %794 = vmatpush.msra.mxu3 %v1093_v11 }
 0x430   :  { %1057 = vmatmul.msk.f32.gmra.mxu3 %vm115_vm1, %v444_v37 }
 0x431   :  { %1079 = vmatmul.msk.f32.vlgmr.msrb.gmra.mxu0 %vm115_vm1, %v529_v40 }
 0x435   :  { %v560_v41 = vpop.f32.mrf.mxu2 }
 0x436   :  { %1080 = vmatpush.xpose.msk.msra.mxu1 %vm115_vm1, %v560_v41  ;;  %v1102_v41 = vld [vmem:[%s1505_s1 + $0x178] sm:$0xff] }
 0x437   :  { %v532_v42 = vpop.f32.mrf.mxu1 }
 0x438   :  { %1076 = vmatmul.msk.f32.vlgmr.msrb.gmra.mxu3 %vm29_vm0, %v1232_v7 }
 0x439   :  { %1081 = vmatmul.msk.f32.vlgmr.msra.gmra.mxu1 %vm115_vm1, %v532_v42  ;;  %v1101_v42 = vld [vmem:[%s1505_s1 + $0x170] sm:$0xff] }
 0x43a   :  { %736 = vmatpush.msrb.mxu1 %v1084_v22 }
 0x440   :  { %1077 = vmatmul.msk.f32.gmra.mxu3 %vm29_vm0, %v1240_v9 }
 0x448   :  { %1097 = vmatmul.msk.f32.vlgmr.msra.gmra.mxu3 %vm29_vm0, %v1232_v7 }
 0x450   :  { %1098 = vmatmul.msk.f32.gmra.mxu3 %vm29_vm0, %v1240_v9 }
 0x4ab   :  { %v472_v1 = vpop.f32.mrf.mxu3 }
 0x4ac   :  { %v502_v29 = vadd.f32 %v1401_v46, %v472_v1 }
 0x4ae   :  { %v614_v48 = vpop.f32.mrf.mxu0 }
 0x4af   :  { %v643_v49 = vsel %vm1263_vm2, -1e+30, %v614_v48 }
 0x4b0   :  { %v645_v50 = vsel %vm115_vm1, %v643_v49, -inf }
 0x4b1   :  { %646 = vmax.xlane.f32.xlu2 %v645_v50 }
 0x4b3   :  { %v475_v2 = vpop.f32.mrf.mxu3 }
 0x4b4   :  { %v505_v32 = vadd.f32 %v1403_v47, %v475_v2 }
 0x4b6   :  { %v640_v51 = vpop.f32.mrf.mxu1 }
 0x4b7   :  { %v644_v52 = vsel %vm1263_vm2, -1e+30, %v640_v51 }
 0x4b8   :  { %v648_v53 = vsel %vm115_vm1, %v644_v52, -inf }
 0x4b9   :  { %649 = vmax.xlane.f32.xlu0 %v648_v53 }
 0x4bb   :  { %v585_v4 = vpop.f32.mrf.mxu3 }
 0x4bc   :  { %685 = vmatpush.msrb.mxu2 %v585_v4 }
 0x4be   :  { %763 = vmatpush.msra.mxu2 %v1090_v6 }
 0x4c0   :  { %764 = vmatpush.msra.mxu2 %v1089_v10 }
 0x4c2   :  { %765 = vmatpush.msra.mxu2 %v1088_v12 }
 0x4c3   :  { %v588_v13 = vpop.f32.mrf.mxu3 }
 0x4c4   :  { %708 = vmatpush.msra.mxu0 %v588_v13  ;;  %766 = vmatpush.msra.mxu2 %v1087_v14 }
 0x4c6   :  { %819 = vmatpush.msrb.mxu0 %v1102_v41 }
 0x4c8   :  { %820 = vmatpush.msrb.mxu0 %v1101_v42 }
 0x4ca   :  { %821 = vmatpush.msrb.mxu0 %v1100_v43 }
 0x4cb   :  { %v796_v23 = vpop.f32.mrf.mxu3 }
 0x4cc   :  { %1105 = vmatpush.xpose.msk.msra.mxu1 %vm115_vm1, %v796_v23  ;;  %822 = vmatpush.msrb.mxu0 %v1099_v20 }
 0x4d3   :  { %v799_v24 = vpop.f32.mrf.mxu3 }
 0x524   :  { %v647_v55 = vpop.xlane.xlu2 %646 }
 0x525   :  { %v651_v56 = vsub.f32 %v643_v49, %v647_v55 }
 0x527   :  { %v653_v57 = vmul.f32 1.442695, %v651_v56 }
 0x529   :  { %1138 = vpow2.f32 %v653_v57 }
 0x52c   :  { %v650_v58 = vpop.xlane.xlu0 %649 }
 0x52d   :  { %v652_v59 = vsub.f32 %v644_v52, %v650_v58 }
 0x52f   :  { %v1139_v60 = vpop.eup %1138  ;;  %v655_v61 = vmul.f32 1.442695, %v652_v59 }
 0x530   :  { %v657_v62 = vsel %vm115_vm1, %v1139_v60, 0.0 }
 0x531   :  { %1140 = vpow2.f32 %v655_v61  ;;  %658 = vadd.xlane.f32.xlu1 %v657_v62 }
 0x537   :  { %v1141_v63 = vpop.eup %1140 }
 0x538   :  { %v660_v0 = vsel %vm115_vm1, %v1141_v63, 0.0 }
 0x539   :  { %661 = vadd.xlane.f32.xlu2 %v660_v0 }
 0x5a4   :  { %v659_v15 = vpop.xlane.xlu1 %658 }
 0x5a5   :  { %1142 = vrcp.f32 %v659_v15 }
 0x5ab   :  { %v1143_v16 = vpop.eup %1142 }
 0x5ac   :  { %v665_v17 = vmul.f32 %v1143_v16, %v1139_v60  ;;  %v662_v18 = vpop.xlane.xlu2 %661  ;;  %v1111_v60 = vld [vmem:[%s1506_s2 + $0x18] sm:$0xff] }
 0x5ad   :  { %1144 = vrcp.f32 %v662_v18 }
 0x5ae   :  { %1082 = vmatmul.msk.f32.vlgmr.msrb.gmra.mxu2 %vm115_vm1, %v665_v17 }
 0x5af   :  { %1107 = vmatpush.xpose.msk.msrb.mxu2 %vm115_vm1, %v799_v24 }
 0x5b3   :  { %v1145_v19 = vpop.eup %1144 }
 0x5b4   :  { %v666_v21 = vmul.f32 %v1145_v19, %v1141_v63  ;;  %v1121_v63 = vld [vmem:[%s1507_s3] ss:$0 sm:$0xff]  ;;  %s1182_s3 = smov 8  }
 0x5b6   :  { %1083 = vmatmul.msk.f32.vlgmr.msra.gmra.mxu0 %vm115_vm1, %v666_v21  ;;  %1091 = vmatmul.msk.f32.vlgmr.msra.gmra.mxu2 %vm29_vm0, %v1232_v7 }
 0x5be   :  { %1092 = vmatmul.msk.f32.gmra.mxu2 %vm29_vm0, %v1240_v9  ;;  %1103 = vmatmul.msk.f32.vlgmr.msrb.gmra.mxu0 %vm29_vm0, %v1232_v7 }
 0x5c6   :  { %1104 = vmatmul.msk.f32.gmra.mxu0 %vm29_vm0, %v1240_v9 }
 0x631   :  { %v687_v25 = vpop.f32.mrf.mxu2 }
 0x632   :  { %1085 = vmatmul.msk.f32.vlgmr.msrb.gmra.mxu1 %vm115_vm1, %v687_v25 }
 0x633   :  { %v710_v26 = vpop.f32.mrf.mxu0  ;;  %975 = vmatpush.msrb.mxu1 %v1111_v60 }
 0x639   :  { %v768_v27 = vpop.f32.mrf.mxu2 }
 0x63a   :  { %1086 = vmatmul.msk.f32.gmra.mxu1 %vm115_vm1, %v710_v26 }
 0x63b   :  { %v824_v7 = vpop.f32.mrf.mxu0 }
 0x63c   :  { %924 = vmatpush.msrb.mxu3 %v824_v7 }
 0x641   :  { %v771_v28 = vpop.f32.mrf.mxu2 }
 0x642   :  { %1106 = vmatmul.msk.f32.vlgmr.msra.gmra.mxu1 %vm115_vm1, %v768_v27  ;;  %1108 = vmatmul.msk.f32.vlgmr.msrb.gmra.mxu2 %vm115_vm1, %v771_v28 }
 0x643   :  { %v827_v54 = vpop.f32.mrf.mxu0 }
 0x644   :  { %947 = vmatpush.msra.mxu0 %v827_v54 }
 0x6af   :  { %v738_v30 = vpop.f32.mrf.mxu1 }
 0x6b0   :  { %v744_v31 = vadd.f32 %v738_v30, %v502_v29 }
 0x6b7   :  { %v741_v33 = vpop.f32.mrf.mxu1 }
 0x6b8   :  { %v745_v34 = vadd.f32 %v741_v33, %v505_v32 }
 0x6bf   :  { %v853_v35 = vpop.f32.mrf.mxu1 }
 0x6c0   :  { %v882_v36 = vsel %vm1263_vm2, -1e+30, %v853_v35 }
 0x6c1   :  { %v884_v37 = vsel %vm115_vm1, %v882_v36, -inf }
 0x6c2   :  { %885 = vmax.xlane.f32.xlu0 %v884_v37 }
 0x6c5   :  { %v879_v38 = vpop.f32.mrf.mxu2 }
 0x6c6   :  { %v883_v39 = vsel %vm1263_vm2, -1e+30, %v879_v38 }
 0x6c7   :  { %v887_v40 = vsel %vm115_vm1, %v883_v39, -inf }
 0x6c8   :  { %888 = vmax.xlane.f32.xlu1 %v887_v40 }
 0x735   :  { %v886_v44 = vpop.xlane.xlu0 %885 }
 0x736   :  { %v890_v45 = vsub.f32 %v882_v36, %v886_v44 }
 0x738   :  { %v892_v46 = vmul.f32 1.442695, %v890_v45 }
 0x73a   :  { %1146 = vpow2.f32 %v892_v46 }
 0x73b   :  { %v889_v47 = vpop.xlane.xlu1 %888 }
 0x73c   :  { %v891_v48 = vsub.f32 %v883_v39, %v889_v47 }
 0x73e   :  { %v894_v49 = vmul.f32 1.442695, %v891_v48 }
 0x740   :  { %v1147_v50 = vpop.eup %1146  ;;  %1148 = vpow2.f32 %v894_v49 }
 0x741   :  { %v896_v51 = vsel %vm115_vm1, %v1147_v50, 0.0 }
 0x742   :  { %897 = vadd.xlane.f32.xlu2 %v896_v51 }
 0x746   :  { %v1149_v52 = vpop.eup %1148 }
 0x747   :  { %v899_v53 = vsel %vm115_vm1, %v1149_v52, 0.0 }
 0x748   :  { %900 = vadd.xlane.f32.xlu0 %v899_v53 }
 0x7b5   :  { %v898_v9 = vpop.xlane.xlu2 %897 }
 0x7b6   :  { %1150 = vrcp.f32 %v898_v9 }
 0x7bb   :  { %v901_v55 = vpop.xlane.xlu0 %900 }
 0x7bc   :  { %v1151_v56 = vpop.eup %1150  ;;  %1152 = vrcp.f32 %v901_v55 }
 0x7bd   :  { %v904_v57 = vmul.f32 %v1151_v56, %v1147_v50 }
 0x7bf   :  { %1109 = vmatmul.msk.f32.vlgmr.msrb.gmra.mxu3 %vm115_vm1, %v904_v57 }
 0x7c2   :  { %v1153_v58 = vpop.eup %1152 }
 0x7c3   :  { %v905_v59 = vmul.f32 %v1153_v58, %v1149_v52 }
 0x7c5   :  { %1110 = vmatmul.msk.f32.vlgmr.msra.gmra.mxu0 %vm115_vm1, %v905_v59 }
 0x842   :  { %v926_v61 = vpop.f32.mrf.mxu3  ;;  %v949_v62 = vpop.f32.mrf.mxu0 }
 0x843   :  { %1112 = vmatmul.msk.f32.vlgmr.msrb.gmra.mxu1 %vm115_vm1, %v926_v61 }
 0x84b   :  { %1113 = vmatmul.msk.f32.gmra.mxu1 %vm115_vm1, %v949_v62 }
 0x8c0   :  { %v977_v0 = vpop.f32.mrf.mxu1 }
 0x8c1   :  { %v983_v1 = vadd.f32 %v977_v0, %v744_v31 }
 0x8c3   :  { %v989_v2 = vadd.f32 %v1121_v63, %v983_v1 }
 0x8c5   :  { %991 = vst.msk [vmem:[#allocation2] sm:$0xff] %vm29_vm0, %v989_v2 }
 0x8c8   :  { %v980_v3 = vpop.f32.mrf.mxu1 }
 0x8c9   :  { %v984_v4 = vadd.f32 %v980_v3, %v745_v34 }
 0x8cb   :  { %v990_v5 = vadd.f32 %v1121_v63, %v984_v4 }
 0x8cd   :  { %992 = vst.msk [vmem:[#allocation2 + $0x8] sm:$0xff] %vm29_vm0, %v990_v5 }
 0x8ce   :  { %1005 = dma.vmem_to_hbm [thread:$0]  %s998_s17, 256, %s1000_s19, [#allocation3], %s1181_s20, %s1181_s20, %s1182_s3  }
 0x8cf   :  { %1178 = dma.done.wait [#allocation3], 256  }
 0x8d0   :  { %1179 = vsyncadd [#allocation3], 4294967040 }
 0x8d1   :  { %1010 = vsyncpa [#allocation3], 1 }

</bundles_post_ra>
